<compile_context>
chip_gen: v6e
topology: v6e:2x2x1
jax: 0.10.0
libtpu: 0.0.40
codegen_flags: <defaults>
</compile_context>

<pallas_src>
import functools

import jax
import jax.numpy as jnp
import numpy as np
from jax.experimental import pallas as pl
from jax.experimental.pallas import tpu as pltpu


# --------------------------- HW-aware budgets ------------------------------- #
def _hw_budgets():
    """(vmem_limit_bytes, per-output-tile byte budget), TPU-generation aware."""
    vmem_cap = 64 * 2**20
    try:
        info = pltpu.get_tpu_info()
        vmem_cap = int(getattr(info, "vmem_capacity_bytes", vmem_cap))
    except Exception:
        pass
    if vmem_cap >= 100 * 2**20:          # v5e / v6e: 128 MiB VMEM per core
        return 64 * 2**20, 4 * 2**20
    return 32 * 2**20, 2 * 2**20         # v7x: 64 MiB VMEM per TensorCore


# ------------------------------ Pallas kernel ------------------------------ #
def _conv_bn_act_kernel(x_ref, w_ref, b_ref, o_ref, *, k, th, relu):
    """Stride-1 KxK conv (pre-padded input) + fused BN bias (+ReLU) for one
    (batch, output-row-tile) grid point, as ONE MXU dot with K = k*k*Cin.

    x_ref : (1, Hin, Win, Cin)  bf16, full padded image for this batch index
    w_ref : (k*k*Cin, Cout)     bf16, tap-major weights (BN scale folded in)
    b_ref : (1, Cout)           f32, fused conv+BN bias
    o_ref : (1, TH, Wo, Cout)   output tile (bf16 for ReLU layers, f32 last)
    """
    rt = pl.program_id(1)
    row0 = pl.multiple_of(rt * th, th)
    cin = x_ref.shape[3]
    wo = o_ref.shape[2]
    cout = o_ref.shape[3]

    # Input row slab covering this output-row tile plus its (k-1)-row halo.
    slab = x_ref[0, pl.ds(row0, th + k - 1), :, :]            # (th+k-1, Win, Cin)

    # Tap-concatenated LHS: lane axis ordered (dh, dw, cin) major->minor, which
    # matches the (k*k, Cin, Cout) -> (k*k*Cin, Cout) weight flattening.
    wins = [slab[dh:dh + th, dw:dw + wo, :]
            for dh in range(k) for dw in range(k)]            # k*k x (th, wo, cin)
    lhs = jnp.concatenate(wins, axis=-1).reshape(th * wo, k * k * cin)

    acc = jnp.dot(lhs, w_ref[...], preferred_element_type=jnp.float32)
    y = acc + b_ref[...]                                      # f32 epilogue
    if relu:
        y = jnp.maximum(y, 0.0)
    o_ref[...] = y.reshape(1, th, wo, cout).astype(o_ref.dtype)


def _pick_tile_h(ho, wo, cout, n, itemsize, budget_bytes):
    """Largest divisor of Ho whose output tile fits the per-buffer budget."""
    divs = [d for d in range(1, ho + 1) if ho % d == 0]
    fit = [d for d in divs if d * wo * cout * itemsize <= budget_bytes] or [1]
    th = max(fit)
    # v7x megacore: keep >=2 independent grid points when N == 1.
    if n == 1 and ho // th < 2:
        two = [d for d in fit if ho // d >= 2]
        if two:
            th = max(two)
    # TODO(synk): for awkward Ho with no large divisor this can collapse toward
    # th=1; pad Ho / use a ragged last tile to keep th*wo >= ~512 on big inputs.
    return th


def conv_pallas(x_in, w_mat, bias_row, k, ho, wo, relu, out_dtype):
    n, hin, win, cin = x_in.shape
    kkc, cout = w_mat.shape
    vmem_limit, tile_budget = _hw_budgets()
    out_isize = jnp.dtype(out_dtype).itemsize
    th = _pick_tile_h(ho, wo, cout, n, out_isize, tile_budget)
    grid = (n, ho // th)

    # Advisory only; slightly overstates FLOPs for the stride-2 layers (the
    # space-to-depth rewrite carries 7/16 zero phase taps).
    flops = 2 * n * ho * wo * kkc * cout
    bytes_accessed = (x_in.size * x_in.dtype.itemsize
                      + w_mat.size * w_mat.dtype.itemsize
                      + bias_row.size * 4
                      + n * ho * wo * cout * out_isize)

    kern = functools.partial(_conv_bn_act_kernel, k=k, th=th, relu=relu)
    # TODO(synk): for large images on v7x, replace the resident full-image input
    # block with a halo'd per-row-tile slab to fit the 64 MiB/TC VMEM budget and
    # pipeline input DMA against compute across row tiles.
    return pl.pallas_call(
        kern,
        out_shape=jax.ShapeDtypeStruct((n, ho, wo, cout), out_dtype),
        grid=grid,
        in_specs=[
            # Full padded image for batch i; resident across the row-tile axis,
            # double-buffered/prefetched across the batch axis.
            pl.BlockSpec((1, hin, win, cin), lambda i, r: (i, 0, 0, 0)),
            pl.BlockSpec((kkc, cout), lambda i, r: (0, 0)),
            pl.BlockSpec((1, cout), lambda i, r: (0, 0)),
        ],
        out_specs=pl.BlockSpec((1, th, wo, cout), lambda i, r: (i, r, 0, 0)),
        compiler_params=pltpu.CompilerParams(
            dimension_semantics=("parallel", "parallel"),
            vmem_limit_bytes=vmem_limit),
        cost_estimate=pl.CostEstimate(flops=int(flops), transcendentals=0,
                                      bytes_accessed=int(bytes_accessed)),
    )(x_in, w_mat, bias_row)


# ------------------------------- JAX glue ---------------------------------- #
def _fold_bn(params, eps=1e-5):
    """Fold conv bias + inference BN into per-channel weight scale & bias."""
    inv_std = 1.0 / jnp.sqrt(params["var"] + eps)
    scale = params["gamma"] * inv_std                                # (Cout,)
    bias = params["beta"] + (params["b"] - params["mean"]) * scale   # (Cout,)
    # (Cout, Cin, KH, KW) -> (KH, KW, Cin, Cout), scale folded into weights.
    w_hwio = jnp.transpose(params["w"], (2, 3, 1, 0)) * scale
    return w_hwio.astype(jnp.bfloat16), bias.astype(jnp.float32)


def _space_to_depth2(x):
    """Zero-pad by 1 and split 2x2 phases into channels: (N,H,W,C)->(N,H',W',4C)."""
    n, h, w, c = x.shape
    xp = jnp.pad(x, ((0, 0), (1, 1), (1, 1), (0, 0)))
    if (h + 2) % 2:
        xp = jnp.pad(xp, ((0, 0), (0, 1), (0, 0), (0, 0)))
    if (w + 2) % 2:
        xp = jnp.pad(xp, ((0, 0), (0, 0), (0, 1), (0, 0)))
    he, we = xp.shape[1], xp.shape[2]
    x2 = xp.reshape(n, he // 2, 2, we // 2, 2, c)
    x2 = jnp.transpose(x2, (0, 1, 3, 2, 4, 5))        # (N, H', W', ph, pw, C)
    return x2.reshape(n, he // 2, we // 2, 4 * c)


def _weights_s2(w_hwio):
    """3x3/stride-2 weights -> (16*Cin, Cout) stride-1 taps over the s2d input."""
    kh, kw, cin, cout = w_hwio.shape
    w2 = jnp.zeros((2, 2, 2, 2, cin, cout), w_hwio.dtype)   # [dr, dc, ph, pw, i, o]
    for dr in range(2):
        for dc in range(2):
            for ph in range(2):
                for pw in range(2):
                    dh, dw = 2 * dr + ph, 2 * dc + pw
                    if dh < kh and dw < kw:
                        w2 = w2.at[dr, dc, ph, pw].set(w_hwio[dh, dw])
    # Flatten (tap=dr*2+dc, phase=ph*2+pw, cin) major->minor -> matches kernel LHS.
    return w2.reshape(4 * 4 * cin, cout)


def conv_bn_layer(x_nhwc, params, stride, relu, out_dtype):
    w_bf16, bias = _fold_bn(params)
    cin, cout = w_bf16.shape[2], w_bf16.shape[3]
    xb = x_nhwc.astype(jnp.bfloat16)
    n, h, w, _ = xb.shape
    ho = (h + 2 - 3) // stride + 1
    wo = (w + 2 - 3) // stride + 1

    if stride == 2:
        # TODO(synk): move the stride-2 sampling in-kernel (strided pl.ds loads)
        # to drop this HBM pad/reshape pass and the 7/16 zero phase-tap FLOPs.
        x_in = _space_to_depth2(xb)[:, :ho + 1, :wo + 1, :]   # (N, ho+1, wo+1, 4Cin)
        w_mat, k = _weights_s2(w_bf16), 2
    else:
        x_in = jnp.pad(xb, ((0, 0), (1, 1), (1, 1), (0, 0)))  # (N, ho+2, wo+2, Cin)
        w_mat, k = w_bf16.reshape(9 * cin, cout), 3

    return conv_pallas(x_in, w_mat, bias.reshape(1, cout), k, ho, wo, relu,
                       out_dtype)


def stem_forward(x_nchw, params):
    x = jnp.transpose(x_nchw, (0, 2, 3, 1))                   # NCHW -> NHWC
    x = conv_bn_layer(x, params[0], stride=2, relu=True, out_dtype=jnp.bfloat16)
    x = conv_bn_layer(x, params[1], stride=2, relu=True, out_dtype=jnp.bfloat16)
    x = conv_bn_layer(x, params[2], stride=1, relu=False, out_dtype=jnp.float32)
    return jnp.transpose(x, (0, 3, 1, 2))                     # NHWC -> NCHW


# --------------------------- parameter creation ----------------------------- #
def make_layer_params(key, cin, cout, k=3):
    ks = jax.random.split(key, 6)
    return {
        "w": 0.1 * jax.random.normal(ks[0], (cout, cin, k, k), jnp.float32),
        "b": 0.1 * jax.random.normal(ks[1], (cout,), jnp.float32),
        "gamma": 1.0 + 0.1 * jax.random.normal(ks[2], (cout,), jnp.float32),
        "beta": 0.1 * jax.random.normal(ks[3], (cout,), jnp.float32),
        "mean": 0.1 * jax.random.normal(ks[4], (cout,), jnp.float32),
        "var": jax.random.uniform(ks[5], (cout,), jnp.float32, 0.5, 1.5),
    }


# ---------------------------- pure-JAX reference ---------------------------- #
def _ref_layer(x_nhwc, params, stride, relu):
    w_bf16, bias = _fold_bn(params)          # same folded bf16 weights as kernel
    y = jax.lax.conv_general_dilated(
        x_nhwc.astype(jnp.bfloat16), w_bf16,
        window_strides=(stride, stride), padding=((1, 1), (1, 1)),
        dimension_numbers=("NHWC", "HWIO", "NHWC"),
        preferred_element_type=jnp.float32) + bias
    return jnp.maximum(y, 0.0) if relu else y


def stem_ref(x_nchw, params):
    x = jnp.transpose(x_nchw, (0, 2, 3, 1))
    x = _ref_layer(x, params[0], 2, True)
    x = _ref_layer(x, params[1], 2, True)
    x = _ref_layer(x, params[2], 1, False)
    return jnp.transpose(x, (0, 3, 1, 2))


# ---------------------------------- main ------------------------------------ #
if __name__ == "__main__":
    # Small synthetic config consistent with Stem(in_channel, out_channel):
    in_channel, out_channel = 4, 32
    N, H, W = 2, 16, 16

    root = jax.random.PRNGKey(0)
    kx, k1, k2, k3 = jax.random.split(root, 4)
    x = jax.random.normal(kx, (N, in_channel, H, W), jnp.float32)  # NCHW input

    params = [
        make_layer_params(k1, in_channel, out_channel // 2),
        make_layer_params(k2, out_channel // 2, out_channel),
        make_layer_params(k3, out_channel, out_channel),
    ]

    out = jax.block_until_ready(jax.jit(stem_forward)(x, params))
    ref = jax.block_until_ready(jax.jit(stem_ref)(x, params))

    assert out.shape == (N, out_channel, H // 4, W // 4), out.shape
    # Same bf16 quantization points in both paths (the ref's f32 intermediates
    # are cast to bf16 at the next layer, matching the kernel's bf16 outputs);
    # remaining differences are f32 accumulation order only.
    np.testing.assert_allclose(np.asarray(out), np.asarray(ref),
                               rtol=2e-2, atol=2e-2)

    print("KERNEL_OK")
</pallas_src>

<mosaic_0001>
module attributes {stable_mosaic.version = 11 : i64} {
  func.func @_conv_bn_act_kernel(%arg0: i32, %arg1: i32, %arg2: memref<1x9x9x16xbf16, #tpu.memory_space<vmem>>, %arg3: memref<64x16xbf16, #tpu.memory_space<vmem>>, %arg4: memref<1x16xf32, #tpu.memory_space<vmem>>, %arg5: memref<1x8x8x16xbf16, #tpu.memory_space<vmem>>) attributes {dimension_semantics = [#tpu.dimension_semantics<parallel>, #tpu.dimension_semantics<parallel>], iteration_bounds = array<i64: 2, 1>, scalar_prefetch = 0 : i64, scratch_operands = 0 : i64, tpu.core_type = #tpu.core_type<tc>, window_params = [{transform_indices = @transform_0, window_bounds = array<i64: 1, 9, 9, 16>}, {pipeline_mode = #tpu.pipeline_mode<synchronous>, transform_indices = @transform_1, window_bounds = array<i64: 64, 16>}, {pipeline_mode = #tpu.pipeline_mode<synchronous>, transform_indices = @transform_2, window_bounds = array<i64: 1, 16>}, {transform_indices = @transform_3, window_bounds = array<i64: 1, 8, 8, 16>}]} {
    %c8_i32 = arith.constant 8 : i32
    %0 = arith.muli %arg1, %c8_i32 : i32
    %1 = tpu.assume_multiple %0, 8 : i32
    %c0 = arith.constant 0 : index
    %2 = arith.index_cast %1 : i32 to index
    %c0_0 = arith.constant 0 : index
    %c0_1 = arith.constant 0 : index
    %3 = vector.load %arg2[%c0, %2, %c0_0, %c0_1] : memref<1x9x9x16xbf16, #tpu.memory_space<vmem>>, vector<1x9x9x16xbf16>
    %4 = vector.shape_cast %3 : vector<1x9x9x16xbf16> to vector<9x9x16xbf16>
    %5 = vector.extract_strided_slice %4 {offsets = [0, 0, 0], sizes = [8, 8, 16], strides = [1, 1, 1]} : vector<9x9x16xbf16> to vector<8x8x16xbf16>
    %6 = vector.extract_strided_slice %4 {offsets = [0, 1, 0], sizes = [8, 8, 16], strides = [1, 1, 1]} : vector<9x9x16xbf16> to vector<8x8x16xbf16>
    %7 = vector.extract_strided_slice %4 {offsets = [1, 0, 0], sizes = [8, 8, 16], strides = [1, 1, 1]} : vector<9x9x16xbf16> to vector<8x8x16xbf16>
    %8 = vector.extract_strided_slice %4 {offsets = [1, 1, 0], sizes = [8, 8, 16], strides = [1, 1, 1]} : vector<9x9x16xbf16> to vector<8x8x16xbf16>
    %9 = tpu.concatenate %5, %6, %7, %8 in 2 : vector<8x8x16xbf16>, vector<8x8x16xbf16>, vector<8x8x16xbf16>, vector<8x8x16xbf16> -> vector<8x8x64xbf16>
    %10 = vector.shape_cast %9 : vector<8x8x64xbf16> to vector<64x64xbf16>
    %c0_2 = arith.constant 0 : index
    %c0_3 = arith.constant 0 : index
    %11 = vector.load %arg3[%c0_2, %c0_3] : memref<64x16xbf16, #tpu.memory_space<vmem>>, vector<64x16xbf16>
    %cst = arith.constant dense<0.000000e+00> : vector<64x16xf32>
    %12 = tpu.matmul %10, %11, %cst {dimension_numbers = #tpu.dot_dimension_numbers<[1], [0], [0], [1], [0, 0, 1, 1], [], []>} : vector<64x64xbf16>, vector<64x16xbf16>, vector<64x16xf32> -> vector<64x16xf32>
    %c0_4 = arith.constant 0 : index
    %c0_5 = arith.constant 0 : index
    %13 = vector.load %arg4[%c0_4, %c0_5] : memref<1x16xf32, #tpu.memory_space<vmem>>, vector<1x16xf32>
    %14 = vector.broadcast %13 : vector<1x16xf32> to vector<64x16xf32>
    %15 = arith.addf %12, %14 : vector<64x16xf32>
    %cst_6 = arith.constant 0.000000e+00 : f32
    %16 = vector.broadcast %cst_6 : f32 to vector<64x16xf32>
    %17 = arith.maximumf %15, %16 : vector<64x16xf32>
    %18 = vector.shape_cast %17 : vector<64x16xf32> to vector<1x8x8x16xf32>
    %19 = arith.truncf %18 : vector<1x8x8x16xf32> to vector<1x8x8x16xbf16>
    %c0_7 = arith.constant 0 : index
    %c0_8 = arith.constant 0 : index
    %c0_9 = arith.constant 0 : index
    %c0_10 = arith.constant 0 : index
    %20 = vector.load %arg5[%c0_7, %c0_8, %c0_9, %c0_10] : memref<1x8x8x16xbf16, #tpu.memory_space<vmem>>, vector<1x8x8x16xbf16>
    tpu.vector_store %arg5[%c0_7, %c0_8, %c0_9, %c0_10], %19 {strides = array<i32>} : memref<1x8x8x16xbf16, #tpu.memory_space<vmem>>, vector<1x8x8x16xbf16>,
    return
  }
  func.func @transform_0(%arg0: i32, %arg1: i32) -> (i32, i32, i32, i32) {
    %c0_i32 = arith.constant 0 : i32
    %c0_i32_0 = arith.constant 0 : i32
    %c0_i32_1 = arith.constant 0 : i32
    %c0_i32_2 = arith.constant 0 : i32
    return %arg0, %c0_i32, %c0_i32_0, %c0_i32_1 : i32, i32, i32, i32
  }
  func.func @transform_1(%arg0: i32, %arg1: i32) -> (i32, i32) {
    %c0_i32 = arith.constant 0 : i32
    %c0_i32_0 = arith.constant 0 : i32
    %c0_i32_1 = arith.constant 0 : i32
    return %c0_i32, %c0_i32_0 : i32, i32
  }
  func.func @transform_2(%arg0: i32, %arg1: i32) -> (i32, i32) {
    %c0_i32 = arith.constant 0 : i32
    %c0_i32_0 = arith.constant 0 : i32
    %c0_i32_1 = arith.constant 0 : i32
    return %c0_i32, %c0_i32_0 : i32, i32
  }
  func.func @transform_3(%arg0: i32, %arg1: i32) -> (i32, i32, i32, i32) {
    %c0_i32 = arith.constant 0 : i32
    %c0_i32_0 = arith.constant 0 : i32
    %c0_i32_1 = arith.constant 0 : i32
    return %arg0, %arg1, %c0_i32, %c0_i32_0 : i32, i32, i32, i32
  }
}

module attributes {stable_mosaic.version = 11 : i64} {
  func.func @_conv_bn_act_kernel(%arg0: i32, %arg1: i32, %arg2: memref<1x5x5x64xbf16, #tpu.memory_space<vmem>>, %arg3: memref<256x32xbf16, #tpu.memory_space<vmem>>, %arg4: memref<1x32xf32, #tpu.memory_space<vmem>>, %arg5: memref<1x4x4x32xbf16, #tpu.memory_space<vmem>>) attributes {dimension_semantics = [#tpu.dimension_semantics<parallel>, #tpu.dimension_semantics<parallel>], iteration_bounds = array<i64: 2, 1>, scalar_prefetch = 0 : i64, scratch_operands = 0 : i64, tpu.core_type = #tpu.core_type<tc>, window_params = [{transform_indices = @transform_0, window_bounds = array<i64: 1, 5, 5, 64>}, {pipeline_mode = #tpu.pipeline_mode<synchronous>, transform_indices = @transform_1, window_bounds = array<i64: 256, 32>}, {pipeline_mode = #tpu.pipeline_mode<synchronous>, transform_indices = @transform_2, window_bounds = array<i64: 1, 32>}, {transform_indices = @transform_3, window_bounds = array<i64: 1, 4, 4, 32>}]} {
    %c4_i32 = arith.constant 4 : i32
    %0 = arith.muli %arg1, %c4_i32 : i32
    %1 = tpu.assume_multiple %0, 4 : i32
    %c0 = arith.constant 0 : index
    %2 = arith.index_cast %1 : i32 to index
    %c0_0 = arith.constant 0 : index
    %c0_1 = arith.constant 0 : index
    %3 = vector.load %arg2[%c0, %2, %c0_0, %c0_1] : memref<1x5x5x64xbf16, #tpu.memory_space<vmem>>, vector<1x5x5x64xbf16>
    %4 = vector.shape_cast %3 : vector<1x5x5x64xbf16> to vector<5x5x64xbf16>
    %5 = vector.extract_strided_slice %4 {offsets = [0, 0, 0], sizes = [4, 4, 64], strides = [1, 1, 1]} : vector<5x5x64xbf16> to vector<4x4x64xbf16>
    %6 = vector.extract_strided_slice %4 {offsets = [0, 1, 0], sizes = [4, 4, 64], strides = [1, 1, 1]} : vector<5x5x64xbf16> to vector<4x4x64xbf16>
    %7 = vector.extract_strided_slice %4 {offsets = [1, 0, 0], sizes = [4, 4, 64], strides = [1, 1, 1]} : vector<5x5x64xbf16> to vector<4x4x64xbf16>
    %8 = vector.extract_strided_slice %4 {offsets = [1, 1, 0], sizes = [4, 4, 64], strides = [1, 1, 1]} : vector<5x5x64xbf16> to vector<4x4x64xbf16>
    %9 = tpu.concatenate %5, %6, %7, %8 in 2 : vector<4x4x64xbf16>, vector<4x4x64xbf16>, vector<4x4x64xbf16>, vector<4x4x64xbf16> -> vector<4x4x256xbf16>
    %10 = vector.shape_cast %9 : vector<4x4x256xbf16> to vector<16x256xbf16>
    %c0_2 = arith.constant 0 : index
    %c0_3 = arith.constant 0 : index
    %11 = vector.load %arg3[%c0_2, %c0_3] : memref<256x32xbf16, #tpu.memory_space<vmem>>, vector<256x32xbf16>
    %cst = arith.constant dense<0.000000e+00> : vector<16x32xf32>
    %12 = tpu.matmul %10, %11, %cst {dimension_numbers = #tpu.dot_dimension_numbers<[1], [0], [0], [1], [0, 0, 1, 1], [], []>} : vector<16x256xbf16>, vector<256x32xbf16>, vector<16x32xf32> -> vector<16x32xf32>
    %c0_4 = arith.constant 0 : index
    %c0_5 = arith.constant 0 : index
    %13 = vector.load %arg4[%c0_4, %c0_5] : memref<1x32xf32, #tpu.memory_space<vmem>>, vector<1x32xf32>
    %14 = vector.broadcast %13 : vector<1x32xf32> to vector<16x32xf32>
    %15 = arith.addf %12, %14 : vector<16x32xf32>
    %cst_6 = arith.constant 0.000000e+00 : f32
    %16 = vector.broadcast %cst_6 : f32 to vector<16x32xf32>
    %17 = arith.maximumf %15, %16 : vector<16x32xf32>
    %18 = vector.shape_cast %17 : vector<16x32xf32> to vector<1x4x4x32xf32>
    %19 = arith.truncf %18 : vector<1x4x4x32xf32> to vector<1x4x4x32xbf16>
    %c0_7 = arith.constant 0 : index
    %c0_8 = arith.constant 0 : index
    %c0_9 = arith.constant 0 : index
    %c0_10 = arith.constant 0 : index
    %20 = vector.load %arg5[%c0_7, %c0_8, %c0_9, %c0_10] : memref<1x4x4x32xbf16, #tpu.memory_space<vmem>>, vector<1x4x4x32xbf16>
    tpu.vector_store %arg5[%c0_7, %c0_8, %c0_9, %c0_10], %19 {strides = array<i32>} : memref<1x4x4x32xbf16, #tpu.memory_space<vmem>>, vector<1x4x4x32xbf16>,
    return
  }
  func.func @transform_0(%arg0: i32, %arg1: i32) -> (i32, i32, i32, i32) {
    %c0_i32 = arith.constant 0 : i32
    %c0_i32_0 = arith.constant 0 : i32
    %c0_i32_1 = arith.constant 0 : i32
    %c0_i32_2 = arith.constant 0 : i32
    return %arg0, %c0_i32, %c0_i32_0, %c0_i32_1 : i32, i32, i32, i32
  }
  func.func @transform_1(%arg0: i32, %arg1: i32) -> (i32, i32) {
    %c0_i32 = arith.constant 0 : i32
    %c0_i32_0 = arith.constant 0 : i32
    %c0_i32_1 = arith.constant 0 : i32
    return %c0_i32, %c0_i32_0 : i32, i32
  }
  func.func @transform_2(%arg0: i32, %arg1: i32) -> (i32, i32) {
    %c0_i32 = arith.constant 0 : i32
    %c0_i32_0 = arith.constant 0 : i32
    %c0_i32_1 = arith.constant 0 : i32
    return %c0_i32, %c0_i32_0 : i32, i32
  }
  func.func @transform_3(%arg0: i32, %arg1: i32) -> (i32, i32, i32, i32) {
    %c0_i32 = arith.constant 0 : i32
    %c0_i32_0 = arith.constant 0 : i32
    %c0_i32_1 = arith.constant 0 : i32
    return %arg0, %arg1, %c0_i32, %c0_i32_0 : i32, i32, i32, i32
  }
}

module attributes {stable_mosaic.version = 11 : i64} {
  func.func @_conv_bn_act_kernel(%arg0: i32, %arg1: i32, %arg2: memref<1x6x6x32xbf16, #tpu.memory_space<vmem>>, %arg3: memref<288x32xbf16, #tpu.memory_space<vmem>>, %arg4: memref<1x32xf32, #tpu.memory_space<vmem>>, %arg5: memref<1x4x4x32xf32, #tpu.memory_space<vmem>>) attributes {dimension_semantics = [#tpu.dimension_semantics<parallel>, #tpu.dimension_semantics<parallel>], iteration_bounds = array<i64: 2, 1>, scalar_prefetch = 0 : i64, scratch_operands = 0 : i64, tpu.core_type = #tpu.core_type<tc>, window_params = [{transform_indices = @transform_0, window_bounds = array<i64: 1, 6, 6, 32>}, {pipeline_mode = #tpu.pipeline_mode<synchronous>, transform_indices = @transform_1, window_bounds = array<i64: 288, 32>}, {pipeline_mode = #tpu.pipeline_mode<synchronous>, transform_indices = @transform_2, window_bounds = array<i64: 1, 32>}, {transform_indices = @transform_3, window_bounds = array<i64: 1, 4, 4, 32>}]} {
    %c4_i32 = arith.constant 4 : i32
    %0 = arith.muli %arg1, %c4_i32 : i32
    %1 = tpu.assume_multiple %0, 4 : i32
    %c0 = arith.constant 0 : index
    %2 = arith.index_cast %1 : i32 to index
    %c0_0 = arith.constant 0 : index
    %c0_1 = arith.constant 0 : index
    %3 = vector.load %arg2[%c0, %2, %c0_0, %c0_1] : memref<1x6x6x32xbf16, #tpu.memory_space<vmem>>, vector<1x6x6x32xbf16>
    %4 = vector.shape_cast %3 : vector<1x6x6x32xbf16> to vector<6x6x32xbf16>
    %5 = vector.extract_strided_slice %4 {offsets = [0, 0, 0], sizes = [4, 4, 32], strides = [1, 1, 1]} : vector<6x6x32xbf16> to vector<4x4x32xbf16>
    %6 = vector.extract_strided_slice %4 {offsets = [0, 1, 0], sizes = [4, 4, 32], strides = [1, 1, 1]} : vector<6x6x32xbf16> to vector<4x4x32xbf16>
    %7 = vector.extract_strided_slice %4 {offsets = [0, 2, 0], sizes = [4, 4, 32], strides = [1, 1, 1]} : vector<6x6x32xbf16> to vector<4x4x32xbf16>
    %8 = vector.extract_strided_slice %4 {offsets = [1, 0, 0], sizes = [4, 4, 32], strides = [1, 1, 1]} : vector<6x6x32xbf16> to vector<4x4x32xbf16>
    %9 = vector.extract_strided_slice %4 {offsets = [1, 1, 0], sizes = [4, 4, 32], strides = [1, 1, 1]} : vector<6x6x32xbf16> to vector<4x4x32xbf16>
    %10 = vector.extract_strided_slice %4 {offsets = [1, 2, 0], sizes = [4, 4, 32], strides = [1, 1, 1]} : vector<6x6x32xbf16> to vector<4x4x32xbf16>
    %11 = vector.extract_strided_slice %4 {offsets = [2, 0, 0], sizes = [4, 4, 32], strides = [1, 1, 1]} : vector<6x6x32xbf16> to vector<4x4x32xbf16>
    %12 = vector.extract_strided_slice %4 {offsets = [2, 1, 0], sizes = [4, 4, 32], strides = [1, 1, 1]} : vector<6x6x32xbf16> to vector<4x4x32xbf16>
    %13 = vector.extract_strided_slice %4 {offsets = [2, 2, 0], sizes = [4, 4, 32], strides = [1, 1, 1]} : vector<6x6x32xbf16> to vector<4x4x32xbf16>
    %14 = tpu.concatenate %5, %6, %7, %8, %9, %10, %11, %12, %13 in 2 : vector<4x4x32xbf16>, vector<4x4x32xbf16>, vector<4x4x32xbf16>, vector<4x4x32xbf16>, vector<4x4x32xbf16>, vector<4x4x32xbf16>, vector<4x4x32xbf16>, vector<4x4x32xbf16>, vector<4x4x32xbf16> -> vector<4x4x288xbf16>
    %15 = vector.shape_cast %14 : vector<4x4x288xbf16> to vector<16x288xbf16>
    %c0_2 = arith.constant 0 : index
    %c0_3 = arith.constant 0 : index
    %16 = vector.load %arg3[%c0_2, %c0_3] : memref<288x32xbf16, #tpu.memory_space<vmem>>, vector<288x32xbf16>
    %cst = arith.constant dense<0.000000e+00> : vector<16x32xf32>
    %17 = tpu.matmul %15, %16, %cst {dimension_numbers = #tpu.dot_dimension_numbers<[1], [0], [0], [1], [0, 0, 1, 1], [], []>} : vector<16x288xbf16>, vector<288x32xbf16>, vector<16x32xf32> -> vector<16x32xf32>
    %c0_4 = arith.constant 0 : index
    %c0_5 = arith.constant 0 : index
    %18 = vector.load %arg4[%c0_4, %c0_5] : memref<1x32xf32, #tpu.memory_space<vmem>>, vector<1x32xf32>
    %19 = vector.broadcast %18 : vector<1x32xf32> to vector<16x32xf32>
    %20 = arith.addf %17, %19 : vector<16x32xf32>
    %21 = vector.shape_cast %20 : vector<16x32xf32> to vector<1x4x4x32xf32>
    %c0_6 = arith.constant 0 : index
    %c0_7 = arith.constant 0 : index
    %c0_8 = arith.constant 0 : index
    %c0_9 = arith.constant 0 : index
    %22 = vector.load %arg5[%c0_6, %c0_7, %c0_8, %c0_9] : memref<1x4x4x32xf32, #tpu.memory_space<vmem>>, vector<1x4x4x32xf32>
    tpu.vector_store %arg5[%c0_6, %c0_7, %c0_8, %c0_9], %21 {strides = array<i32>} : memref<1x4x4x32xf32, #tpu.memory_space<vmem>>, vector<1x4x4x32xf32>,
    return
  }
  func.func @transform_0(%arg0: i32, %arg1: i32) -> (i32, i32, i32, i32) {
    %c0_i32 = arith.constant 0 : i32
    %c0_i32_0 = arith.constant 0 : i32
    %c0_i32_1 = arith.constant 0 : i32
    %c0_i32_2 = arith.constant 0 : i32
    return %arg0, %c0_i32, %c0_i32_0, %c0_i32_1 : i32, i32, i32, i32
  }
  func.func @transform_1(%arg0: i32, %arg1: i32) -> (i32, i32) {
    %c0_i32 = arith.constant 0 : i32
    %c0_i32_0 = arith.constant 0 : i32
    %c0_i32_1 = arith.constant 0 : i32
    return %c0_i32, %c0_i32_0 : i32, i32
  }
  func.func @transform_2(%arg0: i32, %arg1: i32) -> (i32, i32) {
    %c0_i32 = arith.constant 0 : i32
    %c0_i32_0 = arith.constant 0 : i32
    %c0_i32_1 = arith.constant 0 : i32
    return %c0_i32, %c0_i32_0 : i32, i32
  }
  func.func @transform_3(%arg0: i32, %arg1: i32) -> (i32, i32, i32, i32) {
    %c0_i32 = arith.constant 0 : i32
    %c0_i32_0 = arith.constant 0 : i32
    %c0_i32_1 = arith.constant 0 : i32
    return %arg0, %arg1, %c0_i32, %c0_i32_0 : i32, i32, i32, i32
  }
}

</mosaic_0001>

<bundles_post_ra>
// kernel: stem_forward.3
= control target key start
LH: loop header
LB: loop body
LE: loop exit
PB: predicated region body
PF: predicated region fallthrough
CT: control target
= control target key end

     0   :  { %s854_s12 = smov 0   ;;  %s856_s13 = smov 0   ;;  %s1042_s0 = inlined_call_operand.vmem [shape: bf16[2,9,9,16], index: 0, kind: input, shape index: {}]   ;;  %s1043_s1 = inlined_call_operand.vmem [shape: bf16[64,16], index: 1, kind: input, shape index: {}]   ;;  %s1044_s2 = inlined_call_operand.vmem [shape: f32[1,16], index: 2, kind: input, shape index: {}]   ;;  %s1045_s3 = inlined_call_operand.vmem [shape: bf16[2,8,8,16], index: 3, kind: output, shape index: {}]  }
   0x1   :  { %s858_s14 = smov 0  }
   0x2 LB: > { %s25_s15 = sadd.s32 1, %s825_s13  ;;  %p689_p0 = scmp.ge.s32.totalorder %s829_s14, 1  ;;  %s829_s14 = sphi %s858_s14, %s13_s14   ;;  %s825_s13 = sphi %s856_s13, %s1047_s13   ;;  %s821_s12 = sphi %s854_s12, %s1046_s12  }
   0x3   : > { %p27_p1 = scmp.ge.s32.totalorder %s25_s15, 2  ;;  %p151_p2 = scmp.lt.s32.totalorder %s829_s14, 3 }
   0x5   : > { %s1049_s15 = smov (%p27_p1, %s25_s15), 0  ;;  %p152_p3 = pnand %p689_p0, %p151_p2 }
   0x6   : > { %p179_p4 = scmp.lt.s32.totalorder (!%p152_p3), %s821_s12, 1  ;;  %s831_s20 = smov (!%p152_p3), 32  }
   0x7   : > { %155 = sbr.rel (%p152_p3) target bundleno = 391 (0x187), region = 32  ;;  %s832_s21 = smov (!%p152_p3), 16  }
   0x8   : > { %s833_s30 = smov (!%p152_p3), 48  }
   0xc   : > { %s1051_s12 = smov (!%p179_p4, %s821_s12), 1  ;;  %v803_v57 = vld [vmem:[%s1043_s1 + $0x18] sm:$0xff]   ;;  %v804_v60 = vld [vmem:[%s1043_s1 + $0x10] sm:$0xff]   ;;  %v805_v63 = vld [vmem:[%s1043_s1 + $0x8] sm:$0xff]   ;;  %vm381_vm0 = vcmask 130048   ;;  %vm406_vm1 = vcmask 261120  }
   0xd   : > { %s758_s16 = smul.u32 72, %s1051_s12  ;;  %734 = vmatprep.subr.bf16.mxu0 %v803_v57  ;;  %750 = vmatprep.subr.bf16.mxu1 %v803_v57  ;;  %vm423_vm2 = vcmask 392192   ;;  %vm499_vm3 = vcmask 523264   ;;  %s725_s6 = sshll.u32 %s1051_s12, 5  ;;  %vm593_vm4 = vcmask 125952  }
   0xe   : > { %735 = vmatpush3.bf16.msra.mxu0 %v803_v57  ;;  %754 = vmatpush3.bf16.msra.mxu1 %v803_v57  ;;  %s1015_s9 = scalar_lea.vmem %s1045_s3, %s725_s6 }
   0xf   : > { %s878_s19 = scalar_lea.vmem %s1042_s0, %s758_s16  ;;  %736 = vmatprep.subr.bf16.mxu0 %v804_v60  ;;  %751 = vmatprep.subr.bf16.mxu1 %v804_v60 }
  0x10   : > { %v881_v0 = vld [vmem:[%s878_s19 + $0x10] sm:$0xf]  ;;  %v204_v1 = vld [vmem:[%s878_s19 + $0x14] sm:$0x1]  ;;  %v885_v2 = vld [vmem:[%s878_s19 + $0x8] sm:$0xf] }
  0x11   : > { %v702_v3 = vcombine.low %v881_v0, %v881_v0  ;;  %v202_v4 = vld [vmem:[%s878_s19 + $0xc] sm:$0x1]  ;;  %v701_v5 = vcombine.low %v885_v2, %v885_v2  ;;  %v893_v6 = vld [vmem:[%s878_s19 + $0x20] sm:$0xf]  ;;  %v208_v7 = vld [vmem:[%s878_s19 + $0x24] sm:$0x1]  ;;  %v695_v8 = vcombine.low %v881_v0, %v204_v1 }
  0x12   : > { %v694_v9 = vcombine.low %v885_v2, %v202_v4  ;;  %v697_v10 = vcombine.low %v893_v6, %v208_v7  ;;  %v900_v11 = vld [vmem:[%s878_s19] sm:$0xf]  ;;  %v200_v12 = vld [vmem:[%s878_s19 + $0x4] sm:$0x1]  ;;  %v904_v13 = vld [vmem:[%s878_s19 + $0x28] sm:$0xf]  ;;  %737 = vmatpush3.bf16.msra.mxu0 %v804_v60  ;;  %755 = vmatpush3.bf16.msra.mxu1 %v804_v60  ;;  %v704_v62 = vcombine.low %v893_v6, %v893_v6 }
  0x13   : > { %341 = vrot.lane.b32.xlu1 %v702_v3, %s831_s20  ;;  %339 = vrot.lane.b32.xlu0 %v701_v5, %s831_s20  ;;  %v693_v14 = vcombine.low %v900_v11, %v200_v12  ;;  %v210_v15 = vld [vmem:[%s878_s19 + $0x2c] sm:$0x1]  ;;  %v911_v16 = vld [vmem:[%s878_s19 + $0x18] sm:$0xf]  ;;  %v274_v29 = vshll.u32 %v695_v8, 16  ;;  %v272_v47 = vshrl.u32 %v695_v8, 16  ;;  %v705_v61 = vcombine.low %v904_v13, %v904_v13 }
  0x14   : > { %v286_v17 = vshrl.u32 %v697_v10, 16  ;;  %v288_v18 = vshll.u32 %v697_v10, 16  ;;  %v698_v19 = vcombine.low %v904_v13, %v210_v15  ;;  %v206_v20 = vld [vmem:[%s878_s19 + $0x1c] sm:$0x1]  ;;  %v267_v23 = vshll.u32 %v694_v9, 16  ;;  %738 = vmatprep.subr.bf16.mxu0 %v805_v63  ;;  %752 = vmatprep.subr.bf16.mxu1 %v805_v63  ;;  %v806_v5 = vld [vmem:[%s1043_s1] sm:$0xff]  }
  0x15   : > { %v258_v21 = vshrl.u32 %v693_v14, 16  ;;  %v260_v22 = vshll.u32 %v693_v14, 16  ;;  %v696_v24 = vcombine.low %v911_v16, %v206_v20  ;;  %v917_v25 = vld [vmem:[%s878_s19 + $0x38] sm:$0xf]  ;;  %v214_v30 = vld [vmem:[%s878_s19 + $0x3c] sm:$0x1]  ;;  %v703_v1 = vcombine.low %v911_v16, %v911_v16 }
  0x16   : > { %v290_v26 = vrot.slane %v288_v18, 1  ;;  %v293_v27 = vshrl.u32 %v698_v19, 16  ;;  %v295_v28 = vshll.u32 %v698_v19, 16  ;;  %v265_v32 = vshrl.u32 %v694_v9, 16  ;;  %v921_v35 = vld [vmem:[%s878_s19 + $0x30] sm:$0xf]  ;;  %739 = vmatpush3.bf16.msra.mxu0 %v805_v63  ;;  %756 = vmatpush3.bf16.msra.mxu1 %v805_v63 }
  0x17   : > { %v262_v31 = vrot.slane %v260_v22, 1  ;;  %v269_v33 = vrot.slane %v267_v23, 1  ;;  %v281_v34 = vshll.u32 %v696_v24, 16  ;;  %v700_v38 = vcombine.low %v917_v25, %v214_v30  ;;  %v212_v39 = vld [vmem:[%s878_s19 + $0x34] sm:$0x1]  ;;  %740 = vmatprep.subr.bf16.mxu0 %v806_v5  ;;  %753 = vmatprep.subr.bf16.mxu1 %v806_v5 }
  0x18   : > { %v923_v36 = vor.u32 %v290_v26, %v286_v17  ;;  %v297_v37 = vrot.slane %v295_v28, 1  ;;  %v699_v41 = vcombine.low %v921_v35, %v212_v39  ;;  %v279_v43 = vshrl.u32 %v696_v24, 16  ;;  %v215_v3 = vld [vmem:[%s878_s19 + $0x40] sm:$0xf]  ;;  %v216_v7 = vld [vmem:[%s878_s19 + $0x44] sm:$0x1] }
  0x19   : > { %v263_v40 = vor.u32 %v262_v31, %v258_v21  ;;  %v283_v44 = vrot.slane %v281_v34, 1  ;;  %v309_v45 = vshll.u32 %v700_v38, 16  ;;  %v270_v46 = vor.u32 %v269_v33, %v265_v32 }
  0x1a   : > { %321 = vrot.lane.b32.xlu1 %v923_v36, %s832_s21  ;;  %v930_v42 = vor.u32 %v297_v37, %v293_v27  ;;  %v276_v48 = vrot.slane %v274_v29, 1  ;;  %v302_v49 = vshll.u32 %v699_v41, 16  ;;  %v307_v51 = vshrl.u32 %v700_v38, 16  ;;  %741 = vmatpush3.bf16.msra.mxu0 %v806_v5 }
  0x1b   : > { %313 = vrot.lane.b32.xlu0 %v263_v40, %s832_s21  ;;  %v284_v50 = vor.u32 %v283_v44, %v279_v43  ;;  %v311_v52 = vrot.slane %v309_v45, 1  ;;  %v300_v54 = vshrl.u32 %v699_v41, 16  ;;  %v706_v59 = vcombine.low %v921_v35, %v921_v35  ;;  %757 = vmatpush3.bf16.msra.mxu1 %v806_v5 }
  0x1c   : > { %v277_v53 = vor.u32 %v276_v48, %v272_v47  ;;  %v304_v55 = vrot.slane %v302_v49, 1  ;;  %v708_v4 = vcombine.low %v215_v3, %v215_v3  ;;  %v707_v8 = vcombine.low %v917_v25, %v917_v25 }
  0x1d   : > { %v312_v56 = vor.u32 %v311_v52, %v307_v51  ;;  %v709_v9 = vcombine.low %v215_v3, %v216_v7 }
  0x1e   : > { %323 = vrot.lane.b32.xlu1 %v930_v42, %s832_s21  ;;  %v305_v58 = vor.u32 %v304_v55, %v300_v54 }
  0x1f   : > { %315 = vrot.lane.b32.xlu0 %v270_v46, %s832_s21  ;;  %v361_v10 = vshll.u32 %v709_v9, 16  ;;  %v359_v12 = vshrl.u32 %v709_v9, 16 }
  0x21   : > { %v363_v14 = vrot.slane %v361_v10, 1 }
  0x22   : > { %319 = vrot.lane.b32.xlu1 %v284_v50, %s832_s21 }
  0x23   : > { %317 = vrot.lane.b32.xlu0 %v277_v53, %s832_s21  ;;  %v364_v15 = vor.u32 %v363_v14, %v359_v12 }
  0x26   : > { %327 = vrot.lane.b32.xlu1 %v312_v56, %s832_s21 }
  0x27   : > { %325 = vrot.lane.b32.xlu0 %v305_v58, %s832_s21 }
  0x2a   : > { %349 = vrot.lane.b32.xlu1 %v706_v59, %s831_s20 }
  0x2b   : > { %347 = vrot.lane.b32.xlu0 %v705_v61, %s831_s20 }
  0x2e   : > { %345 = vrot.lane.b32.xlu1 %v704_v62, %s831_s20 }
  0x2f   : > { %343 = vrot.lane.b32.xlu0 %v703_v1, %s831_s20 }
  0x32   : > { %353 = vrot.lane.b32.xlu1 %v708_v4, %s831_s20 }
  0x33   : > { %351 = vrot.lane.b32.xlu0 %v707_v8, %s831_s20 }
  0x36   : > { %367 = vrot.lane.b32.xlu1 %v277_v53, %s833_s30 }
  0x37   : > { %365 = vrot.lane.b32.xlu0 %v270_v46, %s833_s30 }
  0x3a   : > { %375 = vrot.lane.b32.xlu1 %v305_v58, %s833_s30 }
  0x3b   : > { %373 = vrot.lane.b32.xlu0 %v930_v42, %s833_s30 }
  0x3e   : > { %371 = vrot.lane.b32.xlu1 %v923_v36, %s833_s30 }
  0x3f   : > { %369 = vrot.lane.b32.xlu0 %v284_v50, %s833_s30 }
  0x42   : > { %379 = vrot.lane.b32.xlu1 %v364_v15, %s833_s30 }
  0x43   : > { %377 = vrot.lane.b32.xlu0 %v312_v56, %s833_s30 }
  0x85   : > { %v342_v17 = vpop.permute.xlu1 %341  ;;  %v340_v18 = vpop.permute.xlu0 %339 }
  0x8c   : > { %v322_v19 = vpop.permute.xlu1 %321 }
  0x8d   : > { %v314_v20 = vpop.permute.xlu0 %313 }
  0x8e   : > { %v384_v36 = vsel %vm381_vm0, %v900_v11, %v314_v20  ;;  %v396_v11 = vsel %vm381_vm0, %v893_v6, %v322_v19 }
  0x8f   : > { %v408_v40 = vsel %vm406_vm1, %v384_v36, %v340_v18 }
  0x90   : > { %v324_v21 = vpop.permute.xlu1 %323 }
  0x91   : > { %v316_v22 = vpop.permute.xlu0 %315 }
  0x92   : > { %v387_v33 = vsel %vm381_vm0, %v885_v2, %v316_v22  ;;  %v399_v2 = vsel %vm381_vm0, %v904_v13, %v324_v21 }
  0x93   : > { %v410_v38 = vsel %vm406_vm1, %v387_v33, %v342_v17 }
  0x94   : > { %v320_v23 = vpop.permute.xlu1 %319 }
  0x95   : > { %v318_v24 = vpop.permute.xlu0 %317  ;;  %v393_v50 = vsel %vm381_vm0, %v911_v16, %v320_v23 }
  0x96   : > { %v390_v51 = vsel %vm381_vm0, %v881_v0, %v318_v24 }
  0x98   : > { %v328_v26 = vpop.permute.xlu1 %327 }
  0x99   : > { %v326_v27 = vpop.permute.xlu0 %325  ;;  %v405_v16 = vsel %vm381_vm0, %v917_v25, %v328_v26  ;;  %v710_v25 = vld [vmem:[%s1044_s2] ss:$0 sm:$0xff] }
  0x9a   : > { %v402_v0 = vsel %vm381_vm0, %v921_v35, %v326_v27 }
  0x9c   : > { %v350_v28 = vpop.permute.xlu1 %349 }
  0x9d   : > { %v348_v29 = vpop.permute.xlu0 %347  ;;  %v418_v44 = vsel %vm406_vm1, %v399_v2, %v350_v28 }
  0x9e   : > { %v416_v46 = vsel %vm406_vm1, %v396_v11, %v348_v29 }
  0xa0   : > { %v346_v30 = vpop.permute.xlu1 %345 }
  0xa1   : > { %v344_v31 = vpop.permute.xlu0 %343  ;;  %v414_v6 = vsel %vm406_vm1, %v393_v50, %v346_v30 }
  0xa2   : > { %v412_v53 = vsel %vm406_vm1, %v390_v51, %v344_v31 }
  0xa4   : > { %v354_v32 = vpop.permute.xlu1 %353 }
  0xa5   : > { %v352_v34 = vpop.permute.xlu0 %351  ;;  %v422_v58 = vsel %vm406_vm1, %v405_v16, %v354_v32 }
  0xa6   : > { %v420_v60 = vsel %vm406_vm1, %v402_v0, %v352_v34 }
  0xa8   : > { %v368_v37 = vpop.permute.xlu1 %367 }
  0xa9   : > { %v427_v39 = vsel %vm423_vm2, %v410_v38, %v368_v37  ;;  %v366_v41 = vpop.permute.xlu0 %365 }
  0xaa   : > { %v425_v42 = vsel %vm423_vm2, %v408_v40, %v366_v41 }
  0xab   : > { %v711_v43 = vcombine.low %v425_v42, %v427_v39 }
  0xac   : > { %v376_v45 = vpop.permute.xlu1 %375 }
  0xad   : > { %v435_v47 = vsel %vm423_vm2, %v418_v44, %v376_v45  ;;  %742 = vmatprep.mubr.msk.bf16.mxu0 %vm499_vm3, %v711_v43  ;;  %v374_v48 = vpop.permute.xlu0 %373 }
  0xae   : > { %v433_v49 = vsel %vm423_vm2, %v416_v46, %v374_v48 }
  0xaf   : > { %v713_v13 = vcombine.low %v433_v49, %v435_v47 }
  0xb0   : > { %v372_v52 = vpop.permute.xlu1 %371 }
  0xb1   : > { %v431_v54 = vsel %vm423_vm2, %v414_v6, %v372_v52  ;;  %746 = vmatprep.mubr.msk.bf16.mxu1 %vm499_vm3, %v713_v13  ;;  %v370_v55 = vpop.permute.xlu0 %369 }
  0xb2   : > { %v429_v56 = vsel %vm423_vm2, %v412_v53, %v370_v55 }
  0xb3   : > { %v712_v57 = vcombine.low %v429_v56, %v431_v54 }
  0xb4   : > { %v380_v59 = vpop.permute.xlu1 %379 }
  0xb5   : > { %v439_v61 = vsel %vm423_vm2, %v422_v58, %v380_v59  ;;  %743 = vmatmul.mubr.msk.bf16.vlgmr.msra.gmra.mxu0 %vm499_vm3, %v712_v57  ;;  %v378_v62 = vpop.permute.xlu0 %377 }
  0xb6   : > { %v437_v63 = vsel %vm423_vm2, %v420_v60, %v378_v62 }
  0xb7   : > { %v714_v1 = vcombine.low %v437_v63, %v439_v61 }
  0xb9   : > { %747 = vmatmul.mubr.msk.bf16.vlgmr.msra.gmra.mxu1 %vm499_vm3, %v714_v1 }
 0x175   : > { %v744_v35 = vpop.f32.mrf.mxu0 }
 0x176   : > { %v555_v3 = vadd.f32 %v744_v35, %v710_v25 }
 0x177   : > { %v546_v4 = vpop.f32.mrf.mxu0 }
 0x178   : > { %v579_v5 = vmax.f32 %v555_v3, 0.0  ;;  %v547_v7 = vadd.f32 %v710_v25, %v546_v4 }
 0x179   : > { %v745_v8 = vpop.f32.mrf.mxu0  ;;  %v748_v9 = vpop.f32.mrf.mxu1 }
 0x17a   : > { %v587_v10 = vpack.c.bf16 %v579_v5, %v579_v5  ;;  %v577_v12 = vmax.f32 %v547_v7, 0.0  ;;  %v558_v14 = vadd.f32 %v745_v8, %v710_v25  ;;  %v571_v15 = vadd.f32 %v748_v9, %v710_v25 }
 0x17b   : > { %v549_v17 = vpop.f32.mrf.mxu0  ;;  %v562_v18 = vpop.f32.mrf.mxu1 }
 0x17c   : > { %596 = vst.msk [vmem:[%s1015_s9 + $0x8] sm:$0xf] %vm593_vm4, %v587_v10  ;;  %v585_v19 = vpack.c.bf16 %v577_v12, %v577_v12  ;;  %v580_v20 = vmax.f32 %v558_v14, 0.0  ;;  %v583_v21 = vmax.f32 %v571_v15, 0.0  ;;  %v550_v22 = vadd.f32 %v710_v25, %v549_v17 }
 0x17d   : > { %v563_v23 = vadd.f32 %v710_v25, %v562_v18  ;;  %v749_v24 = vpop.f32.mrf.mxu1 }
 0x17e   : > { %594 = vst.msk [vmem:[%s1015_s9] sm:$0xf] %vm593_vm4, %v585_v19  ;;  %v588_v26 = vpack.c.bf16 %v580_v20, %v580_v20  ;;  %v591_v27 = vpack.c.bf16 %v583_v21, %v583_v21  ;;  %v578_v28 = vmax.f32 %v550_v22, 0.0  ;;  %v574_v29 = vadd.f32 %v749_v24, %v710_v25 }
 0x17f   : > { %v581_v30 = vmax.f32 %v563_v23, 0.0  ;;  %v565_v31 = vpop.f32.mrf.mxu1 }
 0x180   : > { %597 = vst.msk [vmem:[%s1015_s9 + $0xc] sm:$0xf] %vm593_vm4, %v588_v26  ;;  %600 = vst.msk [vmem:[%s1015_s9 + $0x18] sm:$0xf] %vm593_vm4, %v591_v27  ;;  %v586_v32 = vpack.c.bf16 %v578_v28, %v578_v28  ;;  %v584_v33 = vmax.f32 %v574_v29, 0.0  ;;  %v566_v34 = vadd.f32 %v710_v25, %v565_v31 }
 0x181   : > { %v589_v36 = vpack.c.bf16 %v581_v30, %v581_v30 }
 0x182   : > { %595 = vst.msk [vmem:[%s1015_s9 + $0x4] sm:$0xf] %vm593_vm4, %v586_v32  ;;  %v592_v37 = vpack.c.bf16 %v584_v33, %v584_v33  ;;  %v582_v38 = vmax.f32 %v566_v34, 0.0 }
 0x183   : > { %598 = vst.msk [vmem:[%s1015_s9 + $0x10] sm:$0xf] %vm593_vm4, %v589_v36 }
 0x184   : > { %601 = vst.msk [vmem:[%s1015_s9 + $0x1c] sm:$0xf] %vm593_vm4, %v592_v37  ;;  %v590_v39 = vpack.c.bf16 %v582_v38, %v582_v38 }
 0x186   : > { %599 = vst.msk [vmem:[%s1015_s9 + $0x14] sm:$0xf] %vm593_vm4, %v590_v39 }
 0x187 PF: > { %s13_s14 = sadd.s32 1, %s829_s14   ;;  %s1046_s12 = smov %s825_s13 }
 0x188   : > { %p10_p5 = scmp.ge.s32.totalorder %s13_s14, 4   ;;  %s1047_s13 = smov %s1049_s15 }
 0x18a   :  { %12 = sbr.rel (!%p10_p5) target bundleno = 2 (0x2), region = 63 }

// kernel: stem_forward.4
= control target key start
LH: loop header
LB: loop body
LE: loop exit
PB: predicated region body
PF: predicated region fallthrough
CT: control target
= control target key end

     0   :  { %s761_s12 = smov 0   ;;  %s763_s13 = smov 0   ;;  %s874_s0 = inlined_call_operand.vmem [shape: bf16[2,5,5,64], index: 0, kind: input, shape index: {}]   ;;  %s875_s1 = inlined_call_operand.vmem [shape: bf16[256,32], index: 1, kind: input, shape index: {}]   ;;  %s876_s2 = inlined_call_operand.vmem [shape: f32[1,32], index: 2, kind: input, shape index: {}]   ;;  %s877_s3 = inlined_call_operand.vmem [shape: bf16[2,4,4,32], index: 3, kind: output, shape index: {}]  }
   0x1   :  { %s765_s14 = smov 0  }
   0x2 LB: > { %s25_s15 = sadd.s32 1, %s733_s13  ;;  %p616_p0 = scmp.ge.s32.totalorder %s737_s14, 1  ;;  %s737_s14 = sphi %s765_s14, %s13_s14   ;;  %s733_s13 = sphi %s763_s13, %s879_s13   ;;  %s729_s12 = sphi %s761_s12, %s878_s12  }
   0x3   : > { %p27_p1 = scmp.ge.s32.totalorder %s25_s15, 2  ;;  %p151_p2 = scmp.lt.s32.totalorder %s737_s14, 3 }
   0x5   : > { %s881_s15 = smov (%p27_p1, %s25_s15), 0  ;;  %p152_p3 = pnand %p616_p0, %p151_p2 }
   0x6   : > { %p179_p4 = scmp.lt.s32.totalorder (!%p152_p3), %s729_s12, 1  ;;  %s739_s11 = smov (!%p152_p3), 64  }
   0x7   : > { %155 = sbr.rel (%p152_p3) target bundleno = 370 (0x172), region = 32 }
   0xc   : > { %v699_v0 = vld [vmem:[%s875_s1 + $0x78] sm:$0xff]   ;;  %s883_s12 = smov (!%p179_p4, %s729_s12), 1  ;;  %v701_v2 = vld [vmem:[%s875_s1 + $0x70] sm:$0xff]   ;;  %v703_v4 = vld [vmem:[%s875_s1 + $0x68] sm:$0xff]   ;;  %v740_v46 = vmov 1983009808   ;;  %v288_v48 = vlaneseq }
   0xd   : > { %v700_v1 = vld [vmem:[%s875_s1 + $0x38] sm:$0xff]   ;;  %645 = vmatprep.subr.bf16.mxu0 %v699_v0  ;;  %s667_s22 = smul.u32 20, %s883_s12  ;;  %v702_v3 = vld [vmem:[%s875_s1 + $0x30] sm:$0xff]   ;;  %v704_v13 = vld [vmem:[%s875_s1 + $0x28] sm:$0xff]   ;;  %v286_v47 = vunpack.c.l.s4 %v740_v46  ;;  %vm263_vm0 = vcmask 523264   ;;  %s644_s5 = sshll.u32 %s883_s12, 3 }
   0xe   : > { %646 = vmatpush3.bf16.msra.mxu0 %v700_v1  ;;  %v705_v16 = vld [vmem:[%s875_s1 + $0x60] sm:$0xff]   ;;  %v707_v33 = vld [vmem:[%s875_s1 + $0x58] sm:$0xff]   ;;  %v709_v39 = vld [vmem:[%s875_s1 + $0x50] sm:$0xff]   ;;  %v289_v52 = vshrl.u32 %v288_v48, 7  ;;  %s192_s8 = scalar_lea.vmem %s877_s3, %s644_s5  ;;  %vm524_vm1 = vcmask 254976  }
   0xf   : > { %647 = vmatprep.subr.bf16.mxu0 %v701_v2  ;;  %s183_s29 = scalar_lea.vmem %s874_s0, %s667_s22  ;;  %v706_v30 = vld [vmem:[%s875_s1 + $0x20] sm:$0xff]   ;;  %v708_v38 = vld [vmem:[%s875_s1 + $0x18] sm:$0xff]   ;;  %v710_v41 = vld [vmem:[%s875_s1 + $0x10] sm:$0xff]   ;;  %v287_v51 = vunpack.c.0.s8 %v286_v47 }
  0x10   : > { %v800_v5 = vld [vmem:[%s183_s29 + $0x8] sm:$0x7]  ;;  %v802_v6 = vld [vmem:[%s183_s29] sm:$0x7]  ;;  %v804_v7 = vld [vmem:[%s183_s29 + $0xc] sm:$0x7] }
  0x11   : > { %v622_v8 = vcombine.low %v800_v5, %v800_v5  ;;  %v620_v9 = vcombine.low %v802_v6, %v802_v6  ;;  %v623_v10 = vcombine.low %v804_v7, %v804_v7  ;;  %v812_v11 = vld [vmem:[%s183_s29 + $0x4] sm:$0x7]  ;;  %v814_v12 = vld [vmem:[%s183_s29 + $0x10] sm:$0x7]  ;;  %v711_v42 = vld [vmem:[%s875_s1 + $0x48] sm:$0xff]   ;;  %v290_v54 = vsub.s32 %v287_v51, %v289_v52 }
  0x12   : > { %648 = vmatpush3.bf16.msra.mxu0 %v702_v3  ;;  %v621_v14 = vcombine.low %v812_v11, %v812_v11  ;;  %v624_v15 = vcombine.low %v814_v12, %v814_v12  ;;  %v712_v43 = vld [vmem:[%s875_s1 + $0x8] sm:$0xff]   ;;  %v713_v44 = vld [vmem:[%s875_s1 + $0x40] sm:$0xff]  }
  0x13   : > { %649 = vmatprep.subr.bf16.mxu0 %v703_v4  ;;  %v230_v17 = vshrl.u32 %v622_v8, 16  ;;  %v232_v18 = vshll.u32 %v622_v8, 16  ;;  %v216_v19 = vshrl.u32 %v620_v9, 16  ;;  %v218_v20 = vshll.u32 %v620_v9, 16  ;;  %v714_v45 = vld [vmem:[%s875_s1] sm:$0xff]  }
  0x14   : > { %v237_v21 = vshrl.u32 %v623_v10, 16  ;;  %v239_v22 = vshll.u32 %v623_v10, 16  ;;  %v225_v23 = vshll.u32 %v621_v14, 16  ;;  %v223_v26 = vshrl.u32 %v621_v14, 16  ;;  %v625_v14 = vld [vmem:[%s876_s2] ss:$0 sm:$0xff] }
  0x15   : > { %v234_v24 = vrot.slane %v232_v18, 1  ;;  %v220_v25 = vrot.slane %v218_v20, 1  ;;  %v257_v27 = vshll.u32 %v624_v15, 16  ;;  %v255_v36 = vshrl.u32 %v624_v15, 16 }
  0x16   : > { %650 = vmatpush3.bf16.msra.mxu0 %v704_v13  ;;  %v241_v28 = vrot.slane %v239_v22, 1  ;;  %v227_v29 = vrot.slane %v225_v23, 1 }
  0x17   : > { %651 = vmatprep.subr.bf16.mxu0 %v705_v16  ;;  %v235_v31 = vor.u32 %v234_v24, %v230_v17  ;;  %v221_v32 = vor.u32 %v220_v25, %v216_v19  ;;  %v259_v37 = vrot.slane %v257_v27, 1 }
  0x18   : > { %v242_v34 = vor.u32 %v241_v28, %v237_v21  ;;  %v228_v35 = vor.u32 %v227_v29, %v223_v26 }
  0x19   : > { %247 = vrot.lane.b32.xlu1 %v235_v31, %s739_s11  ;;  %243 = vrot.lane.b32.xlu0 %v221_v32, %s739_s11  ;;  %v260_v40 = vor.u32 %v259_v37, %v255_v36 }
  0x1a   : > { %652 = vmatpush3.bf16.msra.mxu0 %v706_v30 }
  0x1b   : > { %653 = vmatprep.subr.bf16.mxu0 %v707_v33 }
  0x1d   : > { %249 = vrot.lane.b32.xlu1 %v242_v34, %s739_s11  ;;  %245 = vrot.lane.b32.xlu0 %v228_v35, %s739_s11 }
  0x1e   : > { %654 = vmatpush3.bf16.msra.mxu0 %v708_v38 }
  0x1f   : > { %655 = vmatprep.subr.bf16.mxu0 %v709_v39 }
  0x21   : > { %261 = vrot.lane.b32.xlu0 %v260_v40, %s739_s11 }
  0x22   : > { %656 = vmatpush3.bf16.msra.mxu0 %v710_v41 }
  0x23   : > { %657 = vmatprep.subr.bf16.mxu0 %v711_v42 }
  0x26   : > { %658 = vmatpush3.bf16.msra.mxu0 %v712_v43 }
  0x27   : > { %659 = vmatprep.subr.bf16.mxu0 %v713_v44 }
  0x2a   : > { %660 = vmatpush3.bf16.msra.mxu0 %v714_v45 }
  0x8b   : > { %v248_v49 = vpop.permute.xlu1 %247  ;;  %v244_v50 = vpop.permute.xlu0 %243 }
  0x8c   : > { %v272_v53 = vsel %vm263_vm0, %v800_v5, %v248_v49  ;;  %v266_v57 = vsel %vm263_vm0, %v802_v6, %v244_v50 }
  0x8f   : > { %v250_v55 = vpop.permute.xlu1 %249  ;;  %v246_v56 = vpop.permute.xlu0 %245 }
  0x90   : > { %v275_v58 = vsel %vm263_vm0, %v804_v7, %v250_v55  ;;  %v269_v59 = vsel %vm263_vm0, %v812_v11, %v246_v56 }
  0x91   : > { %v284_v60 = vcombine.low %v266_v57, %v269_v59  ;;  %v292_v61 = vcombine.low %v269_v59, %v272_v53  ;;  %v300_v62 = vcombine.low %v272_v53, %v275_v58 }
  0x93   : > { %v291_v63 = vrot.slane %v284_v60, %v290_v54  ;;  %v299_v0 = vrot.slane %v292_v61, %v290_v54  ;;  %v262_v1 = vpop.permute.xlu0 %261  ;;  %v307_v4 = vrot.slane %v300_v62, %v290_v54 }
  0x94   : > { %v278_v2 = vsel %vm263_vm0, %v814_v12, %v262_v1 }
  0x95   : > { %v308_v3 = vcombine.low %v275_v58, %v278_v2  ;;  %v355_v8 = vcombine.low %v291_v63, %v299_v0 }
  0x97   : > { %v315_v5 = vrot.slane %v308_v3, %v290_v54  ;;  %v363_v10 = vrot.slane %v355_v8, %v290_v54 }
  0x99   : > { %v356_v9 = vcombine.low %v307_v4, %v315_v5 }
  0x9b   : > { %v370_v6 = vrot.slane %v356_v9, %v290_v54 }
  0x9d   : > { %v372_v13 = vcombine.high %v363_v10, %v370_v6  ;;  %v371_v7 = vcombine.low %v363_v10, %v370_v6 }
  0x9f   : > { %503 = vmatprep.mubr.bf16.mxu0 %v372_v13 }
  0xa0   : > { %504 = vmatmul.mubr.bf16.vlgmr.msra.gmra.mxu0 %v371_v7 }
 0x160   : > { %v661_v11 = vpop.f32.mrf.mxu0 }
 0x162   : > { %v662_v15 = vpop.f32.mrf.mxu0 }
 0x163   : > { %v663_v16 = vadd.f32 %v662_v15, %v661_v11 }
 0x164   : > { %v664_v12 = vpop.f32.mrf.mxu0 }
 0x165   : > { %v506_v17 = vadd.f32 %v663_v16, %v625_v14 }
 0x166   : > { %v665_v18 = vpop.f32.mrf.mxu0 }
 0x167   : > { %v512_v19 = vmax.f32 %v506_v17, 0.0  ;;  %v666_v20 = vadd.f32 %v665_v18, %v664_v12 }
 0x169   : > { %v516_v21 = vcombine.high %v512_v19, %v512_v19  ;;  %v520_v22 = vpack.c.bf16 %v512_v19, %v512_v19  ;;  %v509_v23 = vadd.f32 %v666_v20, %v625_v14 }
 0x16b   : > { %v521_v24 = vpack.c.bf16 %v516_v21, %v516_v21  ;;  %525 = vst.msk [vmem:[%s192_s8] sm:$0x3] %vm524_vm1, %v520_v22  ;;  %v513_v25 = vmax.f32 %v509_v23, 0.0 }
 0x16d   : > { %526 = vst.msk [vmem:[%s192_s8 + $0x2] sm:$0x3] %vm524_vm1, %v521_v24  ;;  %v517_v26 = vcombine.high %v513_v25, %v513_v25  ;;  %v522_v27 = vpack.c.bf16 %v513_v25, %v513_v25 }
 0x16f   : > { %v523_v28 = vpack.c.bf16 %v517_v26, %v517_v26  ;;  %527 = vst.msk [vmem:[%s192_s8 + $0x4] sm:$0x3] %vm524_vm1, %v522_v27 }
 0x171   : > { %528 = vst.msk [vmem:[%s192_s8 + $0x6] sm:$0x3] %vm524_vm1, %v523_v28 }
 0x172 PF: > { %s13_s14 = sadd.s32 1, %s737_s14   ;;  %s878_s12 = smov %s733_s13 }
 0x173   : > { %p10_p5 = scmp.ge.s32.totalorder %s13_s14, 4   ;;  %s879_s13 = smov %s881_s15 }
 0x175   :  { %12 = sbr.rel (!%p10_p5) target bundleno = 2 (0x2), region = 63 }

// kernel: stem_forward.5
= control target key start
LH: loop header
LB: loop body
LE: loop exit
PB: predicated region body
PF: predicated region fallthrough
CT: control target
= control target key end

     0   :  { %8 = vsyncpa [#allocation3], 0  ;;  %s1406_s0 = inlined_call_operand.vmem [shape: bf16[2,6,6,32], index: 0, kind: input, shape index: {}]   ;;  %s1407_s1 = inlined_call_operand.vmem [shape: bf16[288,32], index: 1, kind: input, shape index: {}]   ;;  %s1408_s2 = inlined_call_operand.vmem [shape: f32[1,32], index: 2, kind: input, shape index: {}]   ;;  %s1409_s3 = inlined_call_operand.hbm [shape: f32[2,4,4,32], index: 3, kind: output, shape index: {}]  }
   0x1   :  { %10 = vsyncpa [#allocation3 + $0x1], 0  ;;  %s1083_s12 = smov 0   ;;  %s1085_s13 = smov 0  }
   0x2   :  { %s1087_s14 = smov 0   ;;  %s1089_s15 = smov 0  }
   0x3   :  { %s1091_s16 = smov 0   ;;  %s1093_s17 = smov 0  }
   0x4 LB: > { %s814_s18 = sadd.s32 4294967295, %s1053_s17   ;;  %s815_s19 = sadd.s32 4294967294, %s1053_s17   ;;  %s1053_s17 = sphi %s1093_s17, %s16_s17   ;;  %s1049_s16 = sphi %s1091_s16, %s1416_s16   ;;  %s1045_s15 = sphi %s1089_s15, %s1415_s15   ;;  %s1041_s14 = sphi %s1087_s14, %s1414_s14   ;;  %s1037_s13 = sphi %s1085_s13, %s1413_s13   ;;  %s1033_s12 = sphi %s1083_s12, %s1412_s12  }
   0x5   : > { %s28_s20 = sadd.s32 1, %s1049_s16  ;;  %s105_s21 = sadd.s32 1, %s1041_s14 }
   0x6   : > { %p30_p0 = scmp.ge.s32.totalorder %s28_s20, 2  ;;  %p115_p1 = scmp.ne.s32.totalorder %s1041_s14, %s1037_s13 }
   0x7   : > { %p116_p2 = scmp.eq.s32.totalorder %s814_s18, 1  ;;  %p121_p3 = scmp.ne.s32.totalorder %s1037_s13, %s1033_s12 }
   0x8   : > { %s1418_s20 = smov (%p30_p0, %s28_s20), 0  ;;  %p122_p5 = scmp.eq.s32.totalorder %s815_s19, 1 }
   0x9   : > { %p1123_p4 = por %p116_p2, %p115_p1  ;;  %s100_s23 = ssub.s32 %s1049_s16, %s1418_s20 }
   0xa   : > { %p818_p6 = scmp.ge.s32.totalorder %s1053_s17, 1  ;;  %p103_p7 = scmp.eq.s32.totalorder %s100_s23, 0 }
   0xb   : > { %p1130_p8 = por %p122_p5, %p121_p3  ;;  %p154_p9 = scmp.lt.s32.totalorder %s1053_s17, 3 }
   0xc   : > { %s1136_s25 = scalar_select %p103_p7, %s1041_s14, %s105_s21  }
   0xd   : > { %p155_p10 = pnand %p818_p6, %p154_p9 }
   0xe   : > { %p178_p11 = scmp.lt.s32.totalorder (!%p155_p10), %s1045_s15, 1  ;;  %s1055_s4 = smov (!%p155_p10), 32  }
   0xf   : > { %158 = sbr.rel (%p155_p10) target bundleno = 422 (0x1a6), region = 32  ;;  %s1056_s5 = smov (!%p155_p10), 64  }
  0x10   : > { %s1058_s21 = smov (!%p155_p10), 96   ;;  %s175_s11 = sand.u32 (!%p155_p10), 1, %s1037_s13  }
  0x11   : > { %s1061_s7 = smov (!%p155_p10), [#allocation2]  }
  0x12   : > { %s981_s8 = sshll.u32 (!%p155_p10), %s1061_s7, 4  ;;  %s982_s8 = int_to_ptr.vmem [resolvable:$false] %s981_s8 }
  0x13   : > { %s983_s9 = scalar_lea.vmem (!%p155_p10), %s982_s8, 512 }
  0x14   : > { %s179_s26 = scalar_select %p178_p11, %s1045_s15, 1  ;;  %v959_v28 = vld [vmem:[%s1407_s1 + $0x78] sm:$0xff]   ;;  %v961_v32 = vld [vmem:[%s1407_s1 + $0x70] sm:$0xff]   ;;  %v963_v34 = vld [vmem:[%s1407_s1 + $0x68] sm:$0xff]   ;;  %v1057_v36 = vmov 1983009808   ;;  %v379_v38 = vlaneseq }
  0x15   : > { %v960_v29 = vld [vmem:[%s1407_s1 + $0x38] sm:$0xff]   ;;  %857 = vmatprep.subr.bf16.mxu0 %v959_v28  ;;  %v962_v33 = vld [vmem:[%s1407_s1 + $0x30] sm:$0xff]   ;;  %v964_v35 = vld [vmem:[%s1407_s1 + $0x28] sm:$0xff]   ;;  %v377_v37 = vunpack.c.l.s4 %v1057_v36  ;;  %v1059_v60 = vmov 0.0   ;;  %vm1060_vm0 = vmmov 0   ;;  %vm308_vm1 = vcmask 261120  }
  0x16   : > { %s890_s27 = smul.u32 24, %s179_s26  ;;  %858 = vmatpush3.bf16.msra.mxu0 %v960_v29  ;;  %v965_v39 = vld [vmem:[%s1407_s1 + $0x60] sm:$0xff]   ;;  %v380_v43 = vshrl.u32 %v379_v38, 7  ;;  %v967_v44 = vld [vmem:[%s1407_s1 + $0x58] sm:$0xff]   ;;  %v969_v47 = vld [vmem:[%s1407_s1 + $0x50] sm:$0xff]   ;;  %882 = vmatprep.subr.bf16.mxu1 %v1059_v60  ;;  %vm321_vm2 = vcmask 523264  }
  0x17   : > { %859 = vmatprep.subr.bf16.mxu0 %v961_v32  ;;  %v966_v40 = vld [vmem:[%s1407_s1 + $0x20] sm:$0xff]   ;;  %v378_v42 = vunpack.c.0.s8 %v377_v37  ;;  %v968_v45 = vld [vmem:[%s1407_s1 + $0x18] sm:$0xff]   ;;  %v970_v48 = vld [vmem:[%s1407_s1 + $0x10] sm:$0xff]   ;;  %886 = vmatprep.mubr.msk.bf16.mxu1 %vm1060_vm0, %v1059_v60  ;;  %vm330_vm3 = vcmask 785408   ;;  %vm718_vm4 = vcmask 257024   ;;  %s856_s26 = sshll.u32 %s1045_s15, 8 }
  0x18   : > { %s1143_s30 = scalar_lea.vmem %s1406_s0, %s890_s27  ;;  %v971_v54 = vld [vmem:[%s1407_s1 + $0x48] sm:$0xff]   ;;  %v974_v58 = vld [vmem:[%s1407_s1 + $0x40] sm:$0xff]   ;;  %s1359_s15 = scalar_lea.sflag [#allocation3], %s175_s11 }
  0x19   : > { %v1146_v0 = vld [vmem:[%s1143_s30 + $0x8] sm:$0x7]  ;;  %v1149_v1 = vld [vmem:[%s1143_s30 + $0x4] sm:$0x7]  ;;  %v1163_v5 = vld [vmem:[%s1143_s30 + $0xc] sm:$0x7]  ;;  %v1253_v46 = vsub.s32 %v378_v42, %v380_v43 }
  0x1a   : > { %v1153_v2 = vcombine.low %v1146_v0, %v1146_v0  ;;  %v1157_v3 = vcombine.low %v1149_v1, %v1149_v1  ;;  %v1160_v4 = vld [vmem:[%s1143_s30 + $0x10] ss:$0 sps:$4 sm:$0x77]   ;;  %v1167_v6 = vcombine.low %v1163_v5, %v1163_v5  ;;  %v1170_v7 = vld [vmem:[%s1143_s30] sm:$0x7]  ;;  %860 = vmatpush3.bf16.msra.mxu0 %v962_v33  ;;  %v972_v56 = vld [vmem:[%s1407_s1 + $0x8] sm:$0xff]  }
  0x1b   : > { %v821_v10 = vcombine.low %v1170_v7, %v1170_v7  ;;  %v272_v11 = vrot.slane %v1160_v4, 1  ;;  %861 = vmatprep.subr.bf16.mxu0 %v963_v34  ;;  %v958_v41 = vld [vmem:[%s1143_s30 + $0x14] ss:$0 sps:$4 sm:$0x77]   ;;  %v268_v52 = vshll.u32 %v1160_v4, 16  ;;  %v973_v57 = vld [vmem:[%s1407_s1 + $0x88] sm:$0xff]  }
  0x1c   : > { %v1173_v8 = vrot.slane %v1153_v2, 1  ;;  %v243_v9 = vrot.slane %v1157_v3, 1  ;;  %v1183_v12 = vrot.slane %v1167_v6, 1  ;;  %v223_v13 = vshll.u32 %v1153_v2, 16  ;;  %883 = vmatpush3.bf16.msra.mxu1 %v973_v57 }
  0x1d   : > { %v209_v14 = vshll.u32 %v821_v10, 16  ;;  %v221_v15 = vshrl.u32 %v1153_v2, 16  ;;  %v242_v16 = vrot.slane %v821_v10, 1  ;;  %v207_v17 = vshrl.u32 %v821_v10, 16  ;;  %884 = vmatprep.subr.bf16.mxu1 %v1059_v60 }
  0x1e   : > { %275 = vrot.lane.b32.xlu1 %v1173_v8, %s1055_s4  ;;  %273 = vrot.lane.b32.xlu0 %v243_v9, %s1055_s4  ;;  %v225_v18 = vrot.slane %v223_v13, 1  ;;  %v230_v20 = vshll.u32 %v1167_v6, 16  ;;  %v216_v21 = vshll.u32 %v1157_v3, 16  ;;  %v228_v22 = vshrl.u32 %v1167_v6, 16 }
  0x1f   : > { %v211_v19 = vrot.slane %v209_v14, 1  ;;  %v214_v23 = vshrl.u32 %v1157_v3, 16  ;;  %862 = vmatpush3.bf16.msra.mxu0 %v964_v35  ;;  %v389_v49 = vrot.slane %v1173_v8, %v1253_v46  ;;  %v405_v50 = vrot.slane %v1183_v12, %v1253_v46 }
  0x20   : > { %v1198_v24 = vor.u32 %v225_v18, %v221_v15  ;;  %v232_v26 = vrot.slane %v230_v20, 1  ;;  %v218_v27 = vrot.slane %v216_v21, 1  ;;  %863 = vmatprep.subr.bf16.mxu0 %v965_v39  ;;  %v295_v51 = vshll.u32 %v958_v41, 16 }
  0x21   : > { %v212_v25 = vor.u32 %v211_v19, %v207_v17  ;;  %v421_v53 = vrot.slane %v272_v11, %v1253_v46  ;;  %v307_v55 = vrot.slane %v958_v41, 1  ;;  %v829_v59 = vcombine.low %v389_v49, %v405_v50 }
  0x22   : > { %279 = vrot.lane.b32.xlu1 %v272_v11, %s1055_s4  ;;  %277 = vrot.lane.b32.xlu0 %v1183_v12, %s1055_s4  ;;  %v1209_v30 = vor.u32 %v232_v26, %v228_v22  ;;  %v1211_v31 = vor.u32 %v218_v27, %v214_v23  ;;  %v293_v62 = vshrl.u32 %v958_v41, 16  ;;  %v297_v63 = vrot.slane %v295_v51, 1 }
  0x23   : > { %864 = vmatpush3.bf16.msra.mxu0 %v966_v40  ;;  %v437_v61 = vrot.slane %v307_v55, %v1253_v46 }
  0x24   : > { %865 = vmatprep.subr.bf16.mxu0 %v967_v44 }
  0x25   : > { %v831_v10 = vcombine.low %v421_v53, %v437_v61 }
  0x26   : > { %248 = vrot.lane.b32.xlu1 %v243_v9, %s1056_s5  ;;  %246 = vrot.lane.b32.xlu0 %v242_v16, %s1056_s5  ;;  %v976_v9 = vld [vmem:[%s1407_s1 + $0x80] sm:$0xff]  }
  0x27   : > { %866 = vmatpush3.bf16.msra.mxu0 %v968_v45  ;;  %v513_v11 = vrot.slane %v831_v10, %v1253_v46  ;;  %885 = vmatpush3.bf16.msra.mxu1 %v976_v9 }
  0x28   : > { %867 = vmatprep.subr.bf16.mxu0 %v969_v47 }
  0x2a   : > { %238 = vrot.lane.b32.xlu1 %v1198_v24, %s1055_s4  ;;  %234 = vrot.lane.b32.xlu0 %v212_v25, %s1055_s4 }
  0x2b   : > { %868 = vmatpush3.bf16.msra.mxu0 %v970_v48 }
  0x2c   : > { %869 = vmatprep.subr.bf16.mxu0 %v971_v54 }
  0x2e   : > { %240 = vrot.lane.b32.xlu1 %v1209_v30, %s1055_s4  ;;  %236 = vrot.lane.b32.xlu0 %v1211_v31, %s1055_s4  ;;  %s1353_s4 = scalar_lea.hbm %s1409_s3, %s856_s26 }
  0x2f   : > { %870 = vmatpush3.bf16.msra.mxu0 %v972_v56 }
  0x30   : > { %871 = vmatprep.subr.bf16.mxu0 %v974_v58 }
  0x32   : > { %252 = vrot.lane.b32.xlu1 %v1183_v12, %s1056_s5  ;;  %250 = vrot.lane.b32.xlu0 %v1173_v8, %s1056_s5  ;;  %v975_v8 = vld [vmem:[%s1407_s1] sm:$0xff]  }
  0x33   : > { %872 = vmatpush3.bf16.msra.mxu0 %v975_v8 }
  0x36   : > { %286 = vrot.lane.b32.xlu1 %v1167_v6, %s1056_s5  ;;  %284 = vrot.lane.b32.xlu0 %v1153_v2, %s1056_s5 }
  0x3a   : > { %290 = vrot.lane.b32.xlu1 %v958_v41, %s1056_s5  ;;  %288 = vrot.lane.b32.xlu0 %v1160_v4, %s1056_s5 }
  0x3e   : > { %259 = vrot.lane.b32.xlu1 %v1153_v2, %s1058_s21  ;;  %257 = vrot.lane.b32.xlu0 %v1157_v3, %s1058_s21  ;;  %v266_v2 = vshrl.u32 %v1160_v4, 16  ;;  %v270_v3 = vrot.slane %v268_v52, 1 }
  0x40   : > { %v271_v12 = vor.u32 %v270_v3, %v266_v2 }
  0x42   : > { %263 = vrot.lane.b32.xlu1 %v1160_v4, %s1058_s21  ;;  %261 = vrot.lane.b32.xlu0 %v1167_v6, %s1058_s21  ;;  %v499_v6 = vrot.slane %v829_v59, %v1253_v46  ;;  %v298_v4 = vor.u32 %v297_v63, %v293_v62 }
  0x44   : > { %v516_v13 = vcombine.low %v499_v6, %v513_v11 }
  0x46   : > { %301 = vrot.lane.b32.xlu1 %v1209_v30, %s1058_s21  ;;  %299 = vrot.lane.b32.xlu0 %v1198_v24, %s1058_s21 }
  0x47   : > { %887 = vmatmul.mubr.msk.bf16.vlgmr.msra.gmra.mxu1 %vm308_vm1, %v516_v13 }
  0x4a   : > { %305 = vrot.lane.b32.xlu1 %v298_v4, %s1058_s21  ;;  %303 = vrot.lane.b32.xlu0 %v271_v12, %s1058_s21  ;;  %s819_s21 = sshll.u32 %s175_s11, 4 }
  0x4b   : > { %s177_s23 = scalar_lea.vmem [#allocation2], %s819_s21 }
  0x4c   : > { %s739_s27 = sshll.u32 %s177_s23, 4  ;;  %s1356_s27 = int_to_ptr.vmem [resolvable:$true] %s739_s27 }
  0x4d   : > { %s977_s6 = scalar_lea.vmem %s1356_s27, 256  ;;  %p984_p1 = scmp.lt.s32.totalorder %s1356_s27, %s982_s8 }
  0x4e   : > { %p978_p12 = scmp.ne.s32.totalorder %s1356_s27, %s977_s6  ;;  %p985_p2 = scmp.lt.s32.totalorder %s983_s9, %s977_s6 }
  0x50   : > { %p979_p13 = pnand %p978_p12, %p1123_p4  ;;  %p986_p3 = por %p985_p2, %p984_p1 }
  0x52   : > { %p980_p0 = pneg %p979_p13 }
  0x54   : > { %p987_p5 = pnand %p986_p3, %p980_p0 }
  0x90   : > { %v276_v14 = vpop.permute.xlu1 %275  ;;  %v274_v15 = vpop.permute.xlu0 %273 }
  0x91   : > { %v344_v39 = vsel %vm308_vm1, %v1198_v24, %v276_v14  ;;  %v341_v40 = vsel %vm308_vm1, %v1211_v31, %v274_v15 }
  0x94   : > { %v280_v16 = vpop.permute.xlu1 %279  ;;  %v278_v17 = vpop.permute.xlu0 %277 }
  0x95   : > { %v350_v52 = vsel %vm308_vm1, %v271_v12, %v280_v16  ;;  %v347_v53 = vsel %vm308_vm1, %v1209_v30, %v278_v17 }
  0x98   : > { %v249_v18 = vpop.permute.xlu1 %248  ;;  %v247_v19 = vpop.permute.xlu0 %246 }
  0x9c   : > { %v239_v20 = vpop.permute.xlu1 %238  ;;  %v235_v21 = vpop.permute.xlu0 %234 }
  0x9d   : > { %v311_v37 = vsel %vm308_vm1, %v1170_v7, %v235_v21  ;;  %v317_v31 = vsel %vm308_vm1, %v1146_v0, %v239_v20 }
  0x9e   : > { %v323_v44 = vsel %vm321_vm2, %v311_v37, %v247_v19 }
  0xa0   : > { %v241_v22 = vpop.permute.xlu1 %240  ;;  %v237_v23 = vpop.permute.xlu0 %236 }
  0xa1   : > { %v314_v38 = vsel %vm308_vm1, %v1149_v1, %v237_v23  ;;  %v320_v49 = vsel %vm308_vm1, %v1163_v5, %v241_v22 }
  0xa2   : > { %v325_v43 = vsel %vm321_vm2, %v314_v38, %v249_v18  ;;  %v827_v18 = vld [vmem:[%s1408_s2] ss:$0 sm:$0xff] }
  0xa4   : > { %v253_v25 = vpop.permute.xlu1 %252  ;;  %v251_v26 = vpop.permute.xlu0 %250 }
  0xa5   : > { %v329_v54 = vsel %vm321_vm2, %v320_v49, %v253_v25  ;;  %v327_v55 = vsel %vm321_vm2, %v317_v31, %v251_v26 }
  0xa8   : > { %v287_v27 = vpop.permute.xlu1 %286  ;;  %v285_v28 = vpop.permute.xlu0 %284 }
  0xa9   : > { %v354_v41 = vsel %vm321_vm2, %v344_v39, %v287_v27  ;;  %v352_v42 = vsel %vm321_vm2, %v341_v40, %v285_v28 }
  0xac   : > { %v291_v29 = vpop.permute.xlu1 %290  ;;  %v289_v32 = vpop.permute.xlu0 %288 }
  0xad   : > { %v358_v56 = vsel %vm321_vm2, %v350_v52, %v291_v29  ;;  %v356_v57 = vsel %vm321_vm2, %v347_v53, %v289_v32 }
  0xb0   : > { %v260_v33 = vpop.permute.xlu1 %259  ;;  %v258_v34 = vpop.permute.xlu0 %257 }
  0xb1   : > { %v334_v1 = vsel %vm330_vm3, %v325_v43, %v260_v33  ;;  %v332_v47 = vsel %vm330_vm3, %v323_v44, %v258_v34 }
  0xb4   : > { %v264_v35 = vpop.permute.xlu1 %263  ;;  %v262_v36 = vpop.permute.xlu0 %261 }
  0xb5   : > { %v338_v60 = vsel %vm330_vm3, %v329_v54, %v264_v35  ;;  %v336_v61 = vsel %vm330_vm3, %v327_v55, %v262_v36 }
  0xb8   : > { %v302_v7 = vpop.permute.xlu1 %301  ;;  %v300_v45 = vpop.permute.xlu0 %299 }
  0xb9   : > { %v362_v48 = vsel %vm330_vm3, %v354_v41, %v302_v7  ;;  %v360_v24 = vsel %vm330_vm3, %v352_v42, %v300_v45 }
  0xba   : > { %v391_v50 = vcombine.low %v334_v1, %v362_v48  ;;  %v375_v51 = vcombine.low %v332_v47, %v360_v24 }
  0xbc   : > { %v398_v0 = vrot.slane %v391_v50, %v1253_v46  ;;  %v382_v58 = vrot.slane %v375_v51, %v1253_v46  ;;  %v306_v5 = vpop.permute.xlu1 %305  ;;  %v304_v59 = vpop.permute.xlu0 %303 }
  0xbd   : > { %v366_v30 = vsel %vm330_vm3, %v358_v56, %v306_v5  ;;  %v364_v62 = vsel %vm330_vm3, %v356_v57, %v304_v59 }
  0xbe   : > { %v423_v63 = vcombine.low %v338_v60, %v366_v30  ;;  %v407_v2 = vcombine.low %v336_v61, %v364_v62  ;;  %v828_v9 = vcombine.low %v382_v58, %v398_v0 }
  0xc0   : > { %v430_v3 = vrot.slane %v423_v63, %v1253_v46  ;;  %v414_v8 = vrot.slane %v407_v2, %v1253_v46  ;;  %v492_v6 = vrot.slane %v828_v9, %v1253_v46 }
  0xc2   : > { %v830_v10 = vcombine.low %v414_v8, %v430_v3 }
  0xc4   : > { %v506_v11 = vrot.slane %v830_v10, %v1253_v46 }
  0xc6   : > { %v515_v4 = vcombine.high %v492_v6, %v506_v11  ;;  %v514_v12 = vcombine.low %v492_v6, %v506_v11 }
  0xc8   : > { %662 = vmatprep.mubr.bf16.mxu0 %v515_v4 }
  0xc9   : > { %663 = vmatmul.mubr.bf16.vlgmr.msra.gmra.mxu0 %v514_v12 }
 0x107   : > { %v705_v13 = vpop.f32.mrf.mxu1 }
 0x109   : > { %v888_v14 = vpop.f32.mrf.mxu1 }
 0x10b   : > { %v708_v15 = vpop.f32.mrf.mxu1 }
 0x10d   : > { %v889_v16 = vpop.f32.mrf.mxu1 }
 0x189   : > { %v873_v17 = vpop.f32.mrf.mxu0 }
 0x18b   : > { %v874_v19 = vpop.f32.mrf.mxu0 }
 0x18c   : > { %v875_v20 = vadd.f32 %v874_v19, %v873_v17 }
 0x18d   : > { %v876_v21 = vpop.f32.mrf.mxu0 }
 0x18e   : > { %v665_v46 = vadd.f32 %v875_v20, %v827_v18 }
 0x18f   : > { %v877_v22 = vpop.f32.mrf.mxu0 }
 0x190   : > { %v706_v23 = vadd.f32 %v705_v13, %v665_v46  ;;  %v878_v25 = vadd.f32 %v877_v22, %v876_v21 }
 0x192   : > { %v714_v26 = vcombine.high %v706_v23, %v706_v23  ;;  %719 = vst.msk [vmem:[%s177_s23] sm:$0xf] %vm718_vm4, %v706_v23  ;;  %v668_v27 = vadd.f32 %v878_v25, %v827_v18 }
 0x194   : > { %720 = vst.msk [vmem:[%s177_s23 + $0x4] sm:$0xf] %vm718_vm4, %v714_v26  ;;  %v709_v28 = vadd.f32 %v708_v15, %v668_v27 }
 0x196   : > { %v715_v29 = vcombine.high %v709_v28, %v709_v28  ;;  %721 = vst.msk [vmem:[%s177_s23 + $0x8] sm:$0xf] %vm718_vm4, %v709_v28 }
 0x198   : > { %722 = vst.msk [vmem:[%s177_s23 + $0xc] sm:$0xf] %vm718_vm4, %v715_v29 }
 0x199   : > { %990 = shalt.err (!%p987_p5)
}
 0x19a   : > { %s991_s10 = scalar_lea.hbm %s1353_s4, 256  ;;  %s995_s18 = scalar_lea.hbm %s1409_s3, 512 }
 0x19b   : > { %p992_p6 = scmp.ne.s32.totalorder %s1353_s4, %s991_s10  ;;  %p996_p10 = scmp.lt.s32.totalorder %s1353_s4, %s1409_s3 }
 0x19c   : > { %p997_p11 = scmp.lt.s32.totalorder %s995_s18, %s991_s10 }
 0x19d   : > { %p993_p7 = pnand %p992_p6, %p1123_p4 }
 0x19e   : > { %p998_p12 = por %p997_p11, %p996_p10 }
 0x19f   : > { %p994_p9 = pneg %p993_p7 }
 0x1a1   : > { %p999_p13 = pnand %p998_p12, %p994_p9 }
 0x1a3   : > { %1002 = shalt.err (!%p999_p13)
}
 0x1a4   : > { %s1062_s23 = smov 4  }
 0x1a5   : > { %891 = dma.vmem_to_hbm [thread:$0]  (%p1123_p4), %s1356_s27, 256, %s1353_s4, %s1359_s15, %s1056_s5, %s1056_s5, %s1062_s23  }
 0x1a6 PF: > { %p897_p0 = scmp.ge.s32.totalorder %s1053_s17, 2  ;;  %s754_s26 = sand.u32 1, %s1033_s12  }
 0x1a7   : > { %s755_s28 = scalar_lea.sflag [#allocation3], %s754_s26 }
 0x1a8   : > { %p894_p1 = pnand %p897_p0, %p1130_p8 }
 0x1aa   : > { %p895_p2 = pneg %p894_p1 }
 0x1ac   : > { %1028 = dma.done.wait (%p895_p2), %s755_s28, 256  }
 0x1ad   : > { %1030 = vsyncadd (%p895_p2), %s755_s28, 4294967040  ;;  %s16_s17 = sadd.s32 1, %s1053_s17   ;;  %s1412_s12 = smov %s1037_s13 }
 0x1ae   : > { %p13_p3 = scmp.ge.s32.totalorder %s16_s17, 4   ;;  %s1413_s13 = smov %s1041_s14 }
 0x1af   : > { %s1414_s14 = smov %s1136_s25  ;;  %s1415_s15 = smov %s1049_s16 }
 0x1b0   : > { %s1416_s16 = smov %s1418_s20  ;;  %15 = sbr.rel (!%p13_p3) target bundleno = 4 (0x4), region = 68 }
 0x1b5   :  { %760 = vsyncpa [#allocation3], 1 }
 0x1b6   :  { %762 = vsyncpa [#allocation3 + $0x1], 1 }

</bundles_post_ra>
